<compile_context>
chip_gen: v7x
topology: tpu7x:2x2x1
jax: 0.10.0
libtpu: 0.0.40
codegen_flags: <defaults>
</compile_context>

<pallas_src>
import jax
import jax.numpy as jnp
from jax.experimental import pallas as pl
from jax.experimental.pallas import tpu as pltpu


def _round_up(n, m):
    return ((n + m - 1) // m) * m


def effdqn_meal_kernel(x_ref, v_ref, w2_ref, b2_ref, out_ref):
    """Fused forward: h = relu(x_aug @ V_aug); out = h @ W2 + b2 (lane-dense)."""
    x = x_ref[...]                                             # (TB, 4)
    h = jnp.dot(x, v_ref[...], preferred_element_type=jnp.float32)
    h = jnp.maximum(h, 0.0)                                    # (TB, H)  ReLU
    out = jnp.dot(h, w2_ref[...], preferred_element_type=jnp.float32) + b2_ref[...]
    out_ref[...] = out.astype(out_ref.dtype)                   # (TB, NA_PAD)


def effdqn_meal_forward(x, params, *, block_b=512):
    """Wrapper: fold embedders + layer-1 bias into one (4, H) weight, pad to
    lane-dense shapes, and invoke the kernel over a batch grid."""
    (W_s, b_s, W_a, b_a, W_m, b_m, W_1, b_1, W_2, b_2,
     state_emb, action_emb, meal_emb, n_hidden, n_actions) = params

    f32 = jnp.float32
    B = x.shape[0]
    H = n_hidden

    # ---- algebraic fold (done once, outside the kernel) --------------------
    # PyTorch Linear stores W as (out, in); transpose to (in, out) for x @ W.
    ws = W_s.T.astype(f32)                                     # (1, Es)
    wa = W_a.T.astype(f32)                                     # (1, Ea)
    wm = W_m.T.astype(f32)                                     # (1, Em)
    w1 = W_1.T.astype(f32)                                     # (Es+Ea+Em, H)
    w1s = w1[:state_emb, :]
    w1a = w1[state_emb:state_emb + action_emb, :]
    w1m = w1[state_emb + action_emb:, :]

    V = jnp.concatenate([ws @ w1s, wa @ w1a, wm @ w1m], axis=0)        # (3, H)
    c = (b_s.reshape(1, -1) @ w1s + b_a.reshape(1, -1) @ w1a
         + b_m.reshape(1, -1) @ w1m + b_1.reshape(1, -1)).astype(f32)  # (1, H)
    V_aug = jnp.concatenate([V, c], axis=0)                            # (4, H)

    # ---- lane-dense padded second layer ------------------------------------
    NA_PAD = _round_up(n_actions, 128)
    w2 = W_2.T.astype(f32)                                     # (H, nA)
    w2p = jnp.zeros((H, NA_PAD), f32).at[:, :n_actions].set(w2)
    b2p = jnp.zeros((1, NA_PAD), f32).at[:, :n_actions].set(b_2.reshape(1, -1))

    # ---- batch padding / tiling, ones-augmented input -----------------------
    TB = min(block_b, _round_up(B, 8))                         # block_b is 8-aligned
    B_pad = _round_up(B, TB)
    x32 = x.astype(f32)
    x_aug = jnp.concatenate([x32, jnp.ones((B, 1), f32)], axis=1)      # (B, 4)
    if B_pad != B:
        x_aug = jnp.pad(x_aug, ((0, B_pad - B), (0, 0)))
    grid = (B_pad // TB,)

    cost = pl.CostEstimate(
        flops=2 * B_pad * (4 * H + H * NA_PAD),
        transcendentals=0,
        bytes_accessed=4 * (B_pad * 4 + 4 * H + H * NA_PAD + NA_PAD
                            + B_pad * NA_PAD),
    )

    out_padded = pl.pallas_call(
        effdqn_meal_kernel,
        out_shape=jax.ShapeDtypeStruct((B_pad, NA_PAD), f32),
        grid=grid,
        in_specs=[
            pl.BlockSpec((TB, 4), lambda i: (i, 0)),           # x_aug tile
            pl.BlockSpec((4, H), lambda i: (0, 0)),            # V_aug (resident)
            pl.BlockSpec((H, NA_PAD), lambda i: (0, 0)),       # W2    (resident)
            pl.BlockSpec((1, NA_PAD), lambda i: (0, 0)),       # b2    (resident)
        ],
        out_specs=pl.BlockSpec((TB, NA_PAD), lambda i: (i, 0)),
        compiler_params=pltpu.CompilerParams(
            dimension_semantics=("parallel",)),
        cost_estimate=cost,
    )(x_aug, V_aug, w2p, b2p)

    return out_padded[:B, :n_actions]


def reference_forward(x, params):
    """Pure-JAX reference mirroring the PyTorch forward exactly."""
    (W_s, b_s, W_a, b_a, W_m, b_m, W_1, b_1, W_2, b_2, *_rest) = params
    state, action, meal = x[:, 0:1], x[:, 1:2], x[:, 2:3]
    se = state @ W_s.T + b_s
    ae = action @ W_a.T + b_a
    me = meal @ W_m.T + b_m
    obs = jnp.concatenate([se, ae, me], axis=1)
    h = jnp.maximum(obs @ W_1.T + b_1, 0.0)
    return h @ W_2.T + b_2


if __name__ == "__main__":
    # Small, deterministic configuration consistent with the module's forward:
    # split(obs, 1, dim=1) into 3 pieces => observation is (B, 3) and
    # state_size = action_size = meal_size = 1.
    B = 8
    n_actions = 8
    state_size = action_size = meal_size = 1
    state_emb, action_emb, meal_emb = 64, 32, 16
    n_hidden = 128

    key = jax.random.PRNGKey(0)
    ks = jax.random.split(key, 11)
    f32 = jnp.float32

    # PyTorch-convention parameter shapes: weight (out_features, in_features).
    W_s = 0.1 * jax.random.normal(ks[0], (state_emb, state_size), f32)
    b_s = 0.1 * jax.random.normal(ks[1], (state_emb,), f32)
    W_a = 0.1 * jax.random.normal(ks[2], (action_emb, action_size), f32)
    b_a = 0.1 * jax.random.normal(ks[3], (action_emb,), f32)
    W_m = 0.1 * jax.random.normal(ks[4], (meal_emb, meal_size), f32)
    b_m = 0.1 * jax.random.normal(ks[5], (meal_emb,), f32)
    W_1 = 0.1 * jax.random.normal(
        ks[6], (n_hidden, state_emb + action_emb + meal_emb), f32)
    b_1 = 0.1 * jax.random.normal(ks[7], (n_hidden,), f32)
    W_2 = 0.1 * jax.random.normal(ks[8], (n_actions, n_hidden), f32)
    b_2 = 0.1 * jax.random.normal(ks[9], (n_actions,), f32)

    params = (W_s, b_s, W_a, b_a, W_m, b_m, W_1, b_1, W_2, b_2,
              state_emb, action_emb, meal_emb, n_hidden, n_actions)

    observation = jax.random.normal(ks[10], (B, 3), f32)

    out = effdqn_meal_forward(observation, params)
    out = jax.block_until_ready(out)

    ref = reference_forward(observation, params)
    assert out.shape == (B, n_actions)
    assert jnp.allclose(out, ref, atol=1e-4, rtol=1e-4), "mismatch vs reference"

    print("KERNEL_OK")
</pallas_src>

<mosaic_0001>
module attributes {stable_mosaic.version = 11 : i64} {
  func.func @effdqn_meal_kernel(%arg0: i32, %arg1: memref<8x4xf32, #tpu.memory_space<vmem>>, %arg2: memref<4x128xf32, #tpu.memory_space<vmem>>, %arg3: memref<128x128xf32, #tpu.memory_space<vmem>>, %arg4: memref<1x128xf32, #tpu.memory_space<vmem>>, %arg5: memref<8x128xf32, #tpu.memory_space<vmem>>) attributes {dimension_semantics = [#tpu.dimension_semantics<parallel>], iteration_bounds = array<i64: 1>, scalar_prefetch = 0 : i64, scratch_operands = 0 : i64, tpu.core_type = #tpu.core_type<tc>, window_params = [{transform_indices = @transform_0, window_bounds = array<i64: 8, 4>}, {pipeline_mode = #tpu.pipeline_mode<synchronous>, transform_indices = @transform_1, window_bounds = array<i64: 4, 128>}, {pipeline_mode = #tpu.pipeline_mode<synchronous>, transform_indices = @transform_2, window_bounds = array<i64: 128, 128>}, {pipeline_mode = #tpu.pipeline_mode<synchronous>, transform_indices = @transform_3, window_bounds = array<i64: 1, 128>}, {transform_indices = @transform_4, window_bounds = array<i64: 8, 128>}]} {
    %c0 = arith.constant 0 : index
    %c0_0 = arith.constant 0 : index
    %0 = vector.load %arg1[%c0, %c0_0] : memref<8x4xf32, #tpu.memory_space<vmem>>, vector<8x4xf32>
    %c0_1 = arith.constant 0 : index
    %c0_2 = arith.constant 0 : index
    %1 = vector.load %arg2[%c0_1, %c0_2] : memref<4x128xf32, #tpu.memory_space<vmem>>, vector<4x128xf32>
    %cst = arith.constant dense<0.000000e+00> : vector<8x128xf32>
    %2 = tpu.matmul %0, %1, %cst {dimension_numbers = #tpu.dot_dimension_numbers<[1], [0], [0], [1], [0, 0, 1, 1], [], []>} : vector<8x4xf32>, vector<4x128xf32>, vector<8x128xf32> -> vector<8x128xf32>
    %cst_3 = arith.constant 0.000000e+00 : f32
    %3 = vector.broadcast %cst_3 : f32 to vector<8x128xf32>
    %4 = arith.maximumf %2, %3 : vector<8x128xf32>
    %c0_4 = arith.constant 0 : index
    %c0_5 = arith.constant 0 : index
    %5 = vector.load %arg3[%c0_4, %c0_5] : memref<128x128xf32, #tpu.memory_space<vmem>>, vector<128x128xf32>
    %cst_6 = arith.constant dense<0.000000e+00> : vector<8x128xf32>
    %6 = tpu.matmul %4, %5, %cst_6 {dimension_numbers = #tpu.dot_dimension_numbers<[1], [0], [0], [1], [0, 0, 1, 1], [], []>} : vector<8x128xf32>, vector<128x128xf32>, vector<8x128xf32> -> vector<8x128xf32>
    %c0_7 = arith.constant 0 : index
    %c0_8 = arith.constant 0 : index
    %7 = vector.load %arg4[%c0_7, %c0_8] : memref<1x128xf32, #tpu.memory_space<vmem>>, vector<1x128xf32>
    %8 = vector.broadcast %7 : vector<1x128xf32> to vector<8x128xf32>
    %9 = arith.addf %6, %8 : vector<8x128xf32>
    %c0_9 = arith.constant 0 : index
    %c0_10 = arith.constant 0 : index
    %10 = vector.load %arg5[%c0_9, %c0_10] : memref<8x128xf32, #tpu.memory_space<vmem>>, vector<8x128xf32>
    tpu.vector_store %arg5[%c0_9, %c0_10], %9 {strides = array<i32>} : memref<8x128xf32, #tpu.memory_space<vmem>>, vector<8x128xf32>,
    return
  }
  func.func @transform_0(%arg0: i32) -> (i32, i32) {
    %c0_i32 = arith.constant 0 : i32
    %c0_i32_0 = arith.constant 0 : i32
    return %arg0, %c0_i32 : i32, i32
  }
  func.func @transform_1(%arg0: i32) -> (i32, i32) {
    %c0_i32 = arith.constant 0 : i32
    %c0_i32_0 = arith.constant 0 : i32
    %c0_i32_1 = arith.constant 0 : i32
    return %c0_i32, %c0_i32_0 : i32, i32
  }
  func.func @transform_2(%arg0: i32) -> (i32, i32) {
    %c0_i32 = arith.constant 0 : i32
    %c0_i32_0 = arith.constant 0 : i32
    %c0_i32_1 = arith.constant 0 : i32
    return %c0_i32, %c0_i32_0 : i32, i32
  }
  func.func @transform_3(%arg0: i32) -> (i32, i32) {
    %c0_i32 = arith.constant 0 : i32
    %c0_i32_0 = arith.constant 0 : i32
    %c0_i32_1 = arith.constant 0 : i32
    return %c0_i32, %c0_i32_0 : i32, i32
  }
  func.func @transform_4(%arg0: i32) -> (i32, i32) {
    %c0_i32 = arith.constant 0 : i32
    %c0_i32_0 = arith.constant 0 : i32
    return %arg0, %c0_i32 : i32, i32
  }
}

</mosaic_0001>

<bundles_post_ra>
// kernel: tpu_custom_call.1
= control target key start
LH: loop header
LB: loop body
LE: loop exit
PB: predicated region body
PF: predicated region fallthrough
CT: control target
= control target key end

     0   :  { %9 = vsyncpa [#allocation3], 0  ;;  %s428_s0 = inlined_call_operand.vmem [shape: f32[8,4], index: 0, kind: input, shape index: {}]   ;;  %s429_s1 = inlined_call_operand.vmem [shape: f32[4,128], index: 1, kind: input, shape index: {}]   ;;  %s430_s2 = inlined_call_operand.hbm [shape: f32[128,128], index: 2, kind: input, shape index: {}]   ;;  %s431_s3 = inlined_call_operand.vmem [shape: f32[1,128], index: 3, kind: input, shape index: {}]   ;;  %s432_s4 = inlined_call_operand.hbm [shape: f32[8,128], index: 4, kind: output, shape index: {}]  }
   0x1   :  { %10 = vsyncpa [#allocation4], 0  ;;  %s363_s15 = smov [#allocation2]   ;;  %s315_s19 = scalar_lea.hbm %s430_s2, 2048 }
   0x2   :  { %s20_s16 = sshll.u32 %s363_s15, 4  ;;  %p316_p0 = scmp.ne.s32.totalorder %s430_s2, %s315_s19  ;;  %s21_s16 = int_to_ptr.vmem [resolvable:$true] %s20_s16 }
   0x3   :  { %p319_p1 = scmp.lt.u32.totalorder %s315_s19, %s430_s2 }
   0x5   :  { %p321_p2 = pnand %p319_p1, %p316_p0 }
   0x7   :  { %324 = shalt.err (!%p321_p2)
}
   0x8   :  { %s325_s24 = scalar_lea.vmem %s21_s16, 2048  ;;  %p330_p4 = scmp.lt.s32.totalorder %s21_s16, %s21_s16 }
   0x9   :  { %p326_p3 = scmp.ne.s32.totalorder %s21_s16, %s325_s24  ;;  %p331_p5 = scmp.lt.s32.totalorder %s325_s24, %s325_s24 }
   0xb   :  { %p332_p6 = por %p331_p5, %p330_p4 }
   0xd   :  { %p333_p7 = pnand %p332_p6, %p326_p3 }
   0xf   :  { %336 = shalt.err (!%p333_p7)
}
  0x10   :  { %s364_s25 = smov 128   ;;  %s365_s26 = smov 8  }
  0x11   :  { %26 = dma.hbm_to_vmem [thread:$0]  %s430_s2, 2048, %s21_s16, [#allocation3], %s364_s25, %s364_s25, %s365_s26  }
  0x12   :  { %359 = dma.done.wait [#allocation3], 2048  }
  0x13   :  { %360 = vsyncadd [#allocation3], 4294965248  ;;  %v366_v0 = vmov 0.0   ;;  %vm367_vm0 = vmmov 0   ;;  %v368_v1 = vmov 0.0|0.0   ;;  %vm38_vm1 = vcmask 1043456  }
  0x14   :  { %244 = vmatprep.subr.mxu0 %v366_v0  ;;  %246 = vmatprep.mubr.msk.f32.mxu0 %vm367_vm0, %v366_v0  ;;  %vm34_vm2 = vcmask 31744   ;;  %v33_v2 = vld [vmem:[%s429_s1] sm:$0xf]  ;;  %v113_v4 = vld [vmem:[#allocation2] sm:$0xff]  ;;  %v114_v5 = vld [vmem:[#allocation2 + $0x8] sm:$0xff]  ;;  %s369_s2 = smov [#allocation5]  }
  0x15   :  { %284 = vmatprep.subr.bf16.mxu1 %v368_v1  ;;  %281 = vmatprep.mubr.msk.f32.mxu1 %vm367_vm0, %v366_v0  ;;  %v32_v3 = vld [vmem:[%s428_s0] sm:$0xff]  ;;  %v115_v6 = vld [vmem:[#allocation2 + $0x10] sm:$0xff]  ;;  %v285_v8 = vpack.c.bf16 %v114_v5, %v113_v4  ;;  %v117_v10 = vld [vmem:[#allocation2 + $0x20] sm:$0xff]  ;;  %s213_s7 = sshll.u32 %s369_s2, 4  ;;  %s214_s7 = int_to_ptr.vmem [resolvable:$true] %s213_s7 }
  0x16   :  { %245 = vmatpush3.msk.msra.mxu0 %vm38_vm1, %v33_v2  ;;  %v116_v7 = vld [vmem:[#allocation2 + $0x18] sm:$0xff]  ;;  %v118_v11 = vld [vmem:[#allocation2 + $0x28] sm:$0xff]  ;;  %v119_v13 = vld [vmem:[#allocation2 + $0x30] sm:$0xff]  ;;  %s337_s8 = scalar_lea.vmem %s214_s7, 128  ;;  %p342_p9 = scmp.lt.s32.totalorder %s214_s7, %s214_s7 }
  0x17   :  { %247 = vmatmul.mubr.msk.f32.vlgmr.msra.gmra.mrb[0].mxu0 %vm34_vm2, %v32_v3  ;;  %286 = vmatpush3.bf16.msra.mxu1 %v285_v8  ;;  %v288_v9 = vpack.c.bf16 %v116_v7, %v115_v6  ;;  %v291_v12 = vpack.c.bf16 %v118_v11, %v117_v10  ;;  %v120_v14 = vld [vmem:[#allocation2 + $0x38] sm:$0xff]  ;;  %v121_v16 = vld [vmem:[#allocation2 + $0x40] sm:$0xff]  ;;  %v122_v17 = vld [vmem:[#allocation2 + $0x48] sm:$0xff]  ;;  %p338_p8 = scmp.ne.s32.totalorder %s214_s7, %s337_s8  ;;  %p343_p10 = scmp.lt.s32.totalorder %s337_s8, %s337_s8 }
  0x18   :  { %287 = vmatprep.subr.bf16.mxu1 %v368_v1  ;;  %v294_v15 = vpack.c.bf16 %v120_v14, %v119_v13  ;;  %v297_v18 = vpack.c.bf16 %v122_v17, %v121_v16  ;;  %v123_v19 = vld [vmem:[#allocation2 + $0x50] sm:$0xff]  ;;  %v124_v20 = vld [vmem:[#allocation2 + $0x58] sm:$0xff]  ;;  %v125_v22 = vld [vmem:[#allocation2 + $0x60] sm:$0xff] }
  0x19   :  { %v300_v21 = vpack.c.bf16 %v124_v20, %v123_v19  ;;  %v126_v23 = vld [vmem:[#allocation2 + $0x68] sm:$0xff]  ;;  %v127_v25 = vld [vmem:[#allocation2 + $0x70] sm:$0xff]  ;;  %v128_v26 = vld [vmem:[#allocation2 + $0x78] sm:$0xff]  ;;  %p344_p11 = por %p343_p10, %p342_p9 }
  0x1a   :  { %v303_v24 = vpack.c.bf16 %v126_v23, %v125_v22  ;;  %v306_v27 = vpack.c.bf16 %v128_v26, %v127_v25  ;;  %v224_v31 = vld [vmem:[%s431_s3] ss:$0 sm:$0xff] }
  0x1b   :  { %289 = vmatpush3.bf16.msra.mxu1 %v288_v9  ;;  %p345_p12 = pnand %p344_p11, %p338_p8 }
  0x1c   :  { %290 = vmatprep.subr.bf16.mxu1 %v368_v1 }
  0x1f   :  { %292 = vmatpush3.bf16.msra.mxu1 %v291_v12 }
  0x20   :  { %293 = vmatprep.subr.bf16.mxu1 %v368_v1 }
  0x23   :  { %295 = vmatpush3.bf16.msra.mxu1 %v294_v15 }
  0x24   :  { %296 = vmatprep.subr.bf16.mxu1 %v368_v1 }
  0x27   :  { %298 = vmatpush3.bf16.msra.mxu1 %v297_v18 }
  0x28   :  { %299 = vmatprep.subr.bf16.mxu1 %v368_v1 }
  0x2b   :  { %301 = vmatpush3.bf16.msra.mxu1 %v300_v21 }
  0x2c   :  { %302 = vmatprep.subr.bf16.mxu1 %v368_v1 }
  0x2f   :  { %304 = vmatpush3.bf16.msra.mxu1 %v303_v24 }
  0x30   :  { %305 = vmatprep.subr.bf16.mxu1 %v368_v1 }
  0x33   :  { %307 = vmatpush3.bf16.msra.mxu1 %v306_v27 }
  0xea   :  { %v108_v28 = vpop.f32.mrb[0].mxu0 }
  0xeb   :  { %v112_v29 = vmax.f32 %v108_v28, 0.0  ;;  %v248_v30 = vpop.f32.mrb[1].mxu0 }
  0xed   :  { %282 = vmatmul.mubr.f32.vlgmr.msra.gmra.mrb[0].mxu1 %v112_v29 }
 0x1c0   :  { %v202_v32 = vpop.f32.mrb[0].mxu1 }
 0x1c1   :  { %v203_v33 = vadd.f32 %v224_v31, %v202_v32  ;;  %v283_v34 = vpop.f32.mrb[1].mxu1 }
 0x1c3   :  { %206 = vst [vmem:[#allocation5] sm:$0xff] %v203_v33 }
 0x1c4   :  { %348 = shalt.err (!%p345_p12)
}
 0x1c5   :  { %s349_s11 = scalar_lea.hbm %s432_s4, 128 }
 0x1c6   :  { %p350_p13 = scmp.ne.s32.totalorder %s432_s4, %s349_s11  ;;  %p353_p0 = scmp.lt.u32.totalorder %s349_s11, %s432_s4 }
 0x1c8   :  { %p355_p1 = pnand %p353_p0, %p350_p13 }
 0x1ca   :  { %358 = shalt.err (!%p355_p1)
}
 0x1cb   :  { %216 = dma.vmem_to_hbm [thread:$0]  %s214_s7, 128, %s432_s4, [#allocation4]  }
 0x1cc   :  { %361 = dma.done.wait [#allocation4], 128  }
 0x1cd   :  { %362 = vsyncadd [#allocation4], 4294967168 }
 0x1ce   :  { %220 = vsyncpa [#allocation3], 1 }
 0x1cf   :  { %221 = vsyncpa [#allocation4], 1 }

</bundles_post_ra>
